<compile_context>
chip_gen: v7x
topology: tpu7x:2x2x1
jax: 0.10.0
libtpu: 0.0.40
codegen_flags: <defaults>
</compile_context>

<pallas_src>
import math

import jax
import jax.numpy as jnp
from jax.experimental import pallas as pl
from jax.experimental.pallas import tpu as pltpu


# ----------------------------- math helpers ---------------------------------
_GELU_C = math.sqrt(2.0 / math.pi)


def _gelu_tanh(x):
    # PyTorch nn.GELU(approximate='tanh'), computed in f32 (portable to v5e).
    # TODO(synk): on v6e/v7x a bf16 GELU epilogue would halve VPU/EUP work.
    return 0.5 * x * (1.0 + jnp.tanh(_GELU_C * (x + 0.044715 * x * x * x)))


# -------------------------------- kernels ------------------------------------
def _mlp_kernel_resident(x_ref, wfc_ref, bfc_ref, wpm_ref, bpm_ref, o_ref):
    # x_ref: (tm, C) bf16; wfc: (C, H) bf16; bfc: (1, H) f32
    # wpm: (H, C) bf16;    bpm: (1, C) f32
    h = jnp.dot(x_ref[...], wfc_ref[...],
                preferred_element_type=jnp.float32) + bfc_ref[...]
    g = _gelu_tanh(h)
    y = jnp.dot(g.astype(jnp.bfloat16), wpm_ref[...],
                preferred_element_type=jnp.float32) + bpm_ref[...]
    o_ref[...] = y.astype(o_ref.dtype)


def _mlp_kernel_htiled(x_ref, wfc_ref, bfc_ref, wpm_ref, bpm_ref, o_ref,
                       acc_ref):
    # Hidden-dim tiled path: grid = (row_tiles, hidden_tiles).
    # x_ref: (tm, C) bf16; wfc: (C, th) bf16; bfc: (1, th) f32
    # wpm: (th, C) bf16;   bpm: (1, C) f32;   acc: (tm, C) f32 scratch
    j = pl.program_id(1)

    @pl.when(j == 0)
    def _():
        acc_ref[...] = jnp.zeros_like(acc_ref)

    h = jnp.dot(x_ref[...], wfc_ref[...],
                preferred_element_type=jnp.float32) + bfc_ref[...]
    g = _gelu_tanh(h)
    acc_ref[...] += jnp.dot(g.astype(jnp.bfloat16), wpm_ref[...],
                            preferred_element_type=jnp.float32)

    @pl.when(j == pl.num_programs(1) - 1)
    def _():
        o_ref[...] = (acc_ref[...] + bpm_ref[...]).astype(o_ref.dtype)


# --------------------------- sizing / feature checks --------------------------
def _vmem_capacity_bytes():
    try:
        return int(pltpu.get_tpu_info().vmem_capacity_bytes)
    except Exception:
        return 64 << 20  # conservative default: v7x per-TensorCore VMEM


def _resident_vmem_bytes(tm, c, h, out_bytes, wbuf):
    weights = wbuf * 2 * c * h * 2          # c_fc + c_proj, bf16
    biases = wbuf * (h + c) * 4
    x_tiles = 2 * tm * c * 2                # double-buffered bf16 input tiles
    o_tiles = 2 * tm * c * out_bytes        # double-buffered output tiles
    hidden = tm * h * (4 + 2)               # f32 hidden + bf16 copy for 2nd matmul
    return weights + biases + x_tiles + o_tiles + hidden


def _htiled_vmem_bytes(tm, th, c, out_bytes, wbuf):
    weights = 2 * 2 * c * th * 2            # weight slices, double-buffered
    biases = 2 * th * 4 + wbuf * c * 4
    x_tiles = 2 * tm * c * 2
    o_tiles = 2 * tm * c * out_bytes
    hidden = tm * th * (4 + 2)
    acc = tm * c * 4
    return weights + biases + x_tiles + o_tiles + hidden + acc


def _vmem_limit(est, cap):
    return int(min(cap, max(48 << 20, est + (16 << 20))))


def _choose_row_tile(m, fits):
    cands = (512, 256, 128, 64, 32, 16, 8)
    # Prefer tiles that divide m (no wrapper-side pad copy) and keep >= 2 grid
    # steps so a v7x megacore can shard the row axis across both TensorCores.
    for require_multi_step in (True, False):
        for tm in cands:
            if tm <= m and m % tm == 0 and fits(tm):
                if require_multi_step and m // tm < 2:
                    continue
                return tm, m
    # Padding needed (m not a multiple of any candidate, or m < 8).
    for tm in cands:
        if fits(tm) and tm <= max(8, 2 * m):
            return tm, ((m + tm - 1) // tm) * tm
    return 8, ((m + 7) // 8) * 8


def _choose_hidden_tile(h, c, out_bytes, budget, max_hidden_tile):
    cands = [t for t in (2048, 1024, 512, 256, 128) if t <= h and h % t == 0]
    if max_hidden_tile is not None:
        cands = [t for t in cands if t <= max_hidden_tile]
    for th in cands:
        if _htiled_vmem_bytes(8, th, c, out_bytes, 2) + (4 << 20) <= budget:
            return th
    return cands[-1] if cands else h


_SINGLE_BUFFER_SUPPORTED = None


def _probe_kernel(x_ref, o_ref):
    o_ref[...] = x_ref[...] * 2.0


def _single_buffer_weights_supported():
    """One-time feature check: can this jax build single-buffer a constant
    (resident) block via pipeline_mode=pl.Buffered(1)?  Errors from the real
    MLP kernel below are never swallowed; if the probe fails we use default
    double-buffered weight specs and budget 2x weight VMEM accordingly."""
    global _SINGLE_BUFFER_SUPPORTED
    if _SINGLE_BUFFER_SUPPORTED is not None:
        return _SINGLE_BUFFER_SUPPORTED
    if not hasattr(pl, "Buffered"):
        _SINGLE_BUFFER_SUPPORTED = False
        return False
    try:
        x = jnp.zeros((8, 128), jnp.float32)
        out = pl.pallas_call(
            _probe_kernel,
            out_shape=jax.ShapeDtypeStruct((16, 128), jnp.float32),
            grid_spec=pltpu.PrefetchScalarGridSpec(
                num_scalar_prefetch=0,
                grid=(2,),
                in_specs=[pl.BlockSpec((8, 128), lambda i: (0, 0),
                                       pipeline_mode=pl.Buffered(buffer_count=1))],
                out_specs=pl.BlockSpec((8, 128), lambda i: (i, 0)),
            ),
        )(x)
        jax.block_until_ready(out)
        _SINGLE_BUFFER_SUPPORTED = True
    except Exception:
        _SINGLE_BUFFER_SUPPORTED = False
    return _SINGLE_BUFFER_SUPPORTED


# ------------------------------ pallas_call builders --------------------------
def _build_resident_call(m_pad, c, h, tm, out_dtype, single_buffer, vmem_limit):
    def w_spec(shape):
        idx = lambda i: (0,) * len(shape)
        if single_buffer:
            return pl.BlockSpec(shape, idx,
                                pipeline_mode=pl.Buffered(buffer_count=1))
        return pl.BlockSpec(shape, idx)

    out_bytes = jnp.dtype(out_dtype).itemsize
    cost = pl.CostEstimate(
        flops=4 * m_pad * c * h,
        transcendentals=m_pad * h,
        bytes_accessed=m_pad * c * (2 + out_bytes) + 2 * c * h * 2 + (h + c) * 4,
    )
    return pl.pallas_call(
        _mlp_kernel_resident,
        out_shape=jax.ShapeDtypeStruct((m_pad, c), out_dtype),
        grid_spec=pltpu.PrefetchScalarGridSpec(
            num_scalar_prefetch=0,
            grid=(m_pad // tm,),
            in_specs=[
                pl.BlockSpec((tm, c), lambda i: (i, 0)),   # bf16 activations
                w_spec((c, h)), w_spec((1, h)),            # c_fc  weight / bias
                w_spec((h, c)), w_spec((1, c)),            # c_proj weight / bias
            ],
            out_specs=pl.BlockSpec((tm, c), lambda i: (i, 0)),
        ),
        compiler_params=pltpu.CompilerParams(
            dimension_semantics=("parallel",),
            vmem_limit_bytes=vmem_limit,
        ),
        cost_estimate=cost,
    )


def _build_htiled_call(m_pad, c, h, tm, th, out_dtype, single_buffer,
                       vmem_limit):
    def const_spec(shape):
        idx = lambda i, j: (0,) * len(shape)
        if single_buffer:
            return pl.BlockSpec(shape, idx,
                                pipeline_mode=pl.Buffered(buffer_count=1))
        return pl.BlockSpec(shape, idx)

    out_bytes = jnp.dtype(out_dtype).itemsize
    cost = pl.CostEstimate(
        flops=4 * m_pad * c * h,
        transcendentals=m_pad * h,
        bytes_accessed=m_pad * c * (2 + out_bytes) + 2 * c * h * 2 + (h + c) * 4,
    )
    return pl.pallas_call(
        _mlp_kernel_htiled,
        out_shape=jax.ShapeDtypeStruct((m_pad, c), out_dtype),
        grid_spec=pltpu.PrefetchScalarGridSpec(
            num_scalar_prefetch=0,
            grid=(m_pad // tm, h // th),
            in_specs=[
                pl.BlockSpec((tm, c), lambda i, j: (i, 0)),   # x row tile
                pl.BlockSpec((c, th), lambda i, j: (0, j)),   # c_fc weight slice
                pl.BlockSpec((1, th), lambda i, j: (0, j)),   # c_fc bias slice
                pl.BlockSpec((th, c), lambda i, j: (j, 0)),   # c_proj weight slice
                const_spec((1, c)),                           # c_proj bias
            ],
            out_specs=pl.BlockSpec((tm, c), lambda i, j: (i, 0)),
            scratch_shapes=[pltpu.VMEM((tm, c), jnp.float32)],
        ),
        compiler_params=pltpu.CompilerParams(
            dimension_semantics=("parallel", "arbitrary"),
            vmem_limit_bytes=vmem_limit,
        ),
        cost_estimate=cost,
    )


# --------------------------------- wrapper ------------------------------------
def mlp_pallas(x, wfc, bfc, wpm, bpm, *, out_dtype=jnp.bfloat16,
               force_htiled=False, max_hidden_tile=None):
    """Fused GPT-2 MLP forward.  x: (..., C), wfc: (C, 4C), wpm: (4C, C)."""
    orig_shape = x.shape
    c = orig_shape[-1]
    h = wfc.shape[1]
    assert wfc.shape == (c, h), wfc.shape
    assert wpm.shape == (h, c), wpm.shape

    # bf16 activations into the kernel: the MXU sees bf16 anyway, but the
    # HBM->VMEM DMA for every row tile is halved and a per-tile cast vanishes.
    x2 = x.reshape(-1, c)
    if x2.dtype != jnp.bfloat16:
        x2 = x2.astype(jnp.bfloat16)
    m = x2.shape[0]

    out_bytes = jnp.dtype(out_dtype).itemsize
    single_buffer = _single_buffer_weights_supported()
    wbuf = 1 if single_buffer else 2
    cap = _vmem_capacity_bytes()
    budget = cap - (8 << 20)  # headroom for compiler-internal scratch

    def fits_resident(tm):
        return _resident_vmem_bytes(tm, c, h, out_bytes, wbuf) + (4 << 20) <= budget

    use_htiled = force_htiled or not fits_resident(8)

    if not use_htiled:
        tm, m_pad = _choose_row_tile(m, fits_resident)
        est = _resident_vmem_bytes(tm, c, h, out_bytes, wbuf)
        call = _build_resident_call(m_pad, c, h, tm, out_dtype, single_buffer,
                                    _vmem_limit(est, cap))
    else:
        th = _choose_hidden_tile(h, c, out_bytes, budget, max_hidden_tile)

        def fits_tiled(tm):
            return _htiled_vmem_bytes(tm, th, c, out_bytes, wbuf) + (4 << 20) <= budget

        tm, m_pad = _choose_row_tile(m, fits_tiled)
        est = _htiled_vmem_bytes(tm, th, c, out_bytes, wbuf)
        call = _build_htiled_call(m_pad, c, h, tm, th, out_dtype, single_buffer,
                                  _vmem_limit(est, cap))

    if m_pad != m:
        # TODO(synk): a masked tail tile would avoid this pad copy for odd M.
        x2 = jnp.pad(x2, ((0, m_pad - m), (0, 0)))

    wfc_b = wfc.astype(jnp.bfloat16)
    wpm_b = wpm.astype(jnp.bfloat16)
    bfc_f = bfc.reshape(1, h).astype(jnp.float32)
    bpm_f = bpm.reshape(1, c).astype(jnp.float32)

    out = call(x2, wfc_b, bfc_f, wpm_b, bpm_f)
    if m_pad != m:
        out = out[:m]
    return out.reshape(orig_shape)


# ---------------------------- pure-JAX references ----------------------------
def ref_mlp_f32(x, wfc, bfc, wpm, bpm):
    h = x @ wfc + bfc.reshape(1, -1)
    return _gelu_tanh(h) @ wpm + bpm.reshape(1, -1)


def ref_mlp_bf16(x, wfc, bfc, wpm, bpm):
    # Same numerics as the kernel: bf16 matmul inputs, f32 accumulate/epilogue.
    xb = x.astype(jnp.bfloat16)
    h = jnp.dot(xb, wfc.astype(jnp.bfloat16),
                preferred_element_type=jnp.float32) + bfc.reshape(1, -1)
    g = _gelu_tanh(h)
    return jnp.dot(g.astype(jnp.bfloat16), wpm.astype(jnp.bfloat16),
                   preferred_element_type=jnp.float32) + bpm.reshape(1, -1)


# --------------------------------- driver ------------------------------------
def make_params(key, c):
    ks = jax.random.split(key, 4)
    std = 0.02
    wfc = std * jax.random.normal(ks[0], (c, 4 * c), jnp.float32)
    bfc = std * jax.random.normal(ks[1], (1, 4 * c), jnp.float32)
    wpm = std * jax.random.normal(ks[2], (4 * c, c), jnp.float32)
    bpm = std * jax.random.normal(ks[3], (1, c), jnp.float32)
    return wfc, bfc, wpm, bpm


if __name__ == "__main__":
    # Small GPTConfig-like shapes: n_embd=32 -> hidden 4*32 = 128.
    B, T, C = 2, 8, 32
    key = jax.random.PRNGKey(0)
    kx, kp = jax.random.split(key)
    x = jax.random.normal(kx, (B, T, C), jnp.float32)
    wfc, bfc, wpm, bpm = make_params(kp, C)

    x_flat = x.reshape(-1, C)
    ref_matched = ref_mlp_bf16(x_flat, wfc, bfc, wpm, bpm).reshape(B, T, C)
    ref_full = ref_mlp_f32(x_flat, wfc, bfc, wpm, bpm).reshape(B, T, C)

    # Default path: resident weights, bf16 output.
    out_bf16 = jax.block_until_ready(mlp_pallas(x, wfc, bfc, wpm, bpm))
    assert out_bf16.shape == (B, T, C)
    assert out_bf16.dtype == jnp.bfloat16
    err_bf16 = float(jnp.max(jnp.abs(out_bf16.astype(jnp.float32) - ref_full)))
    assert err_bf16 < 2e-2, f"bf16-out mismatch vs f32 reference: {err_bf16}"

    # f32-output path (same kernel, different output dtype).
    out_f32 = jax.block_until_ready(
        mlp_pallas(x, wfc, bfc, wpm, bpm, out_dtype=jnp.float32))
    err_matched = float(jnp.max(jnp.abs(out_f32 - ref_matched)))
    err_full = float(jnp.max(jnp.abs(out_f32 - ref_full)))
    assert err_matched < 2e-3, f"mismatch vs bf16-matched reference: {err_matched}"
    assert err_full < 2e-2, f"mismatch vs f32 reference: {err_full}"

    # Exercise the hidden-tiled (VMEM-constrained / v7x XL) path on a slightly
    # larger toy config so the accumulator runs over >= 2 hidden tiles.
    B2, T2, C2 = 2, 16, 128
    x2 = jax.random.normal(jax.random.PRNGKey(1), (B2, T2, C2), jnp.float32)
    p2 = make_params(jax.random.PRNGKey(2), C2)
    out_t = jax.block_until_ready(
        mlp_pallas(x2, *p2, out_dtype=jnp.float32, force_htiled=True,
                   max_hidden_tile=256))
    ref_t = ref_mlp_f32(x2.reshape(-1, C2), *p2).reshape(B2, T2, C2)
    err_t = float(jnp.max(jnp.abs(out_t - ref_t)))
    assert err_t < 2e-2, f"hidden-tiled path mismatch vs f32 reference: {err_t}"

    print("KERNEL_OK")
</pallas_src>

<mosaic_0001>
module attributes {stable_mosaic.version = 11 : i64} {
  func.func @_probe_kernel(%arg0: i32, %arg1: memref<8x128xf32, #tpu.memory_space<vmem>>, %arg2: memref<8x128xf32, #tpu.memory_space<vmem>>) attributes {dimension_semantics = [#tpu.dimension_semantics<arbitrary>], iteration_bounds = array<i64: 2>, scalar_prefetch = 0 : i64, scratch_operands = 0 : i64, tpu.core_type = #tpu.core_type<tc>, window_params = [{pipeline_mode = #tpu.pipeline_mode<synchronous>, transform_indices = @transform_0, window_bounds = array<i64: 8, 128>}, {transform_indices = @transform_1, window_bounds = array<i64: 8, 128>}]} {
    %c0 = arith.constant 0 : index
    %c0_0 = arith.constant 0 : index
    %0 = vector.load %arg1[%c0, %c0_0] : memref<8x128xf32, #tpu.memory_space<vmem>>, vector<8x128xf32>
    %cst = arith.constant 2.000000e+00 : f32
    %1 = vector.broadcast %cst : f32 to vector<8x128xf32>
    %2 = arith.mulf %0, %1 : vector<8x128xf32>
    %c0_1 = arith.constant 0 : index
    %c0_2 = arith.constant 0 : index
    %3 = vector.load %arg2[%c0_1, %c0_2] : memref<8x128xf32, #tpu.memory_space<vmem>>, vector<8x128xf32>
    tpu.vector_store %arg2[%c0_1, %c0_2], %2 {strides = array<i32>} : memref<8x128xf32, #tpu.memory_space<vmem>>, vector<8x128xf32>,
    return
  }
  func.func @transform_0(%arg0: i32) -> (i32, i32) {
    %c0_i32 = arith.constant 0 : i32
    %c0_i32_0 = arith.constant 0 : i32
    %c0_i32_1 = arith.constant 0 : i32
    return %c0_i32, %c0_i32_0 : i32, i32
  }
  func.func @transform_1(%arg0: i32) -> (i32, i32) {
    %c0_i32 = arith.constant 0 : i32
    %c0_i32_0 = arith.constant 0 : i32
    return %arg0, %c0_i32 : i32, i32
  }
}

module attributes {stable_mosaic.version = 11 : i64} {
  func.func @_mlp_kernel_resident(%arg0: i32, %arg1: memref<8x32xbf16, #tpu.memory_space<vmem>>, %arg2: memref<32x128xbf16, #tpu.memory_space<vmem>>, %arg3: memref<1x128xf32, #tpu.memory_space<vmem>>, %arg4: memref<128x32xbf16, #tpu.memory_space<vmem>>, %arg5: memref<1x32xf32, #tpu.memory_space<vmem>>, %arg6: memref<8x32xbf16, #tpu.memory_space<vmem>>) attributes {dimension_semantics = [#tpu.dimension_semantics<parallel>], iteration_bounds = array<i64: 2>, scalar_prefetch = 0 : i64, scratch_operands = 0 : i64, tpu.core_type = #tpu.core_type<tc>, window_params = [{transform_indices = @transform_0, window_bounds = array<i64: 8, 32>}, {pipeline_mode = #tpu.pipeline_mode<synchronous>, transform_indices = @transform_1, window_bounds = array<i64: 32, 128>}, {pipeline_mode = #tpu.pipeline_mode<synchronous>, transform_indices = @transform_2, window_bounds = array<i64: 1, 128>}, {pipeline_mode = #tpu.pipeline_mode<synchronous>, transform_indices = @transform_3, window_bounds = array<i64: 128, 32>}, {pipeline_mode = #tpu.pipeline_mode<synchronous>, transform_indices = @transform_4, window_bounds = array<i64: 1, 32>}, {transform_indices = @transform_5, window_bounds = array<i64: 8, 32>}]} {
    %c0 = arith.constant 0 : index
    %c0_0 = arith.constant 0 : index
    %0 = vector.load %arg1[%c0, %c0_0] : memref<8x32xbf16, #tpu.memory_space<vmem>>, vector<8x32xbf16>
    %c0_1 = arith.constant 0 : index
    %c0_2 = arith.constant 0 : index
    %1 = vector.load %arg2[%c0_1, %c0_2] : memref<32x128xbf16, #tpu.memory_space<vmem>>, vector<32x128xbf16>
    %cst = arith.constant dense<0.000000e+00> : vector<8x128xf32>
    %2 = tpu.matmul %0, %1, %cst {dimension_numbers = #tpu.dot_dimension_numbers<[1], [0], [0], [1], [0, 0, 1, 1], [], []>} : vector<8x32xbf16>, vector<32x128xbf16>, vector<8x128xf32> -> vector<8x128xf32>
    %c0_3 = arith.constant 0 : index
    %c0_4 = arith.constant 0 : index
    %3 = vector.load %arg3[%c0_3, %c0_4] : memref<1x128xf32, #tpu.memory_space<vmem>>, vector<1x128xf32>
    %4 = vector.broadcast %3 : vector<1x128xf32> to vector<8x128xf32>
    %5 = arith.addf %2, %4 : vector<8x128xf32>
    %cst_5 = arith.constant 5.000000e-01 : f32
    %6 = vector.broadcast %cst_5 : f32 to vector<8x128xf32>
    %7 = arith.mulf %6, %5 : vector<8x128xf32>
    %cst_6 = arith.constant 4.471500e-02 : f32
    %8 = vector.broadcast %cst_6 : f32 to vector<8x128xf32>
    %9 = arith.mulf %8, %5 : vector<8x128xf32>
    %10 = arith.mulf %9, %5 : vector<8x128xf32>
    %11 = arith.mulf %10, %5 : vector<8x128xf32>
    %12 = arith.addf %5, %11 : vector<8x128xf32>
    %cst_7 = arith.constant 0.797884583 : f32
    %13 = vector.broadcast %cst_7 : f32 to vector<8x128xf32>
    %14 = arith.mulf %13, %12 : vector<8x128xf32>
    %15 = math.tanh %14 : vector<8x128xf32>
    %cst_8 = arith.constant 1.000000e+00 : f32
    %16 = vector.broadcast %cst_8 : f32 to vector<8x128xf32>
    %17 = arith.addf %16, %15 : vector<8x128xf32>
    %18 = arith.mulf %7, %17 : vector<8x128xf32>
    %19 = arith.truncf %18 : vector<8x128xf32> to vector<8x128xbf16>
    %c0_9 = arith.constant 0 : index
    %c0_10 = arith.constant 0 : index
    %20 = vector.load %arg4[%c0_9, %c0_10] : memref<128x32xbf16, #tpu.memory_space<vmem>>, vector<128x32xbf16>
    %cst_11 = arith.constant dense<0.000000e+00> : vector<8x32xf32>
    %21 = tpu.matmul %19, %20, %cst_11 {dimension_numbers = #tpu.dot_dimension_numbers<[1], [0], [0], [1], [0, 0, 1, 1], [], []>} : vector<8x128xbf16>, vector<128x32xbf16>, vector<8x32xf32> -> vector<8x32xf32>
    %c0_12 = arith.constant 0 : index
    %c0_13 = arith.constant 0 : index
    %22 = vector.load %arg5[%c0_12, %c0_13] : memref<1x32xf32, #tpu.memory_space<vmem>>, vector<1x32xf32>
    %23 = vector.broadcast %22 : vector<1x32xf32> to vector<8x32xf32>
    %24 = arith.addf %21, %23 : vector<8x32xf32>
    %25 = arith.truncf %24 : vector<8x32xf32> to vector<8x32xbf16>
    %c0_14 = arith.constant 0 : index
    %c0_15 = arith.constant 0 : index
    %26 = vector.load %arg6[%c0_14, %c0_15] : memref<8x32xbf16, #tpu.memory_space<vmem>>, vector<8x32xbf16>
    tpu.vector_store %arg6[%c0_14, %c0_15], %25 {strides = array<i32>} : memref<8x32xbf16, #tpu.memory_space<vmem>>, vector<8x32xbf16>,
    return
  }
  func.func @transform_0(%arg0: i32) -> (i32, i32) {
    %c0_i32 = arith.constant 0 : i32
    %c0_i32_0 = arith.constant 0 : i32
    return %arg0, %c0_i32 : i32, i32
  }
  func.func @transform_1(%arg0: i32) -> (i32, i32) {
    %c0_i32 = arith.constant 0 : i32
    %c0_i32_0 = arith.constant 0 : i32
    %c0_i32_1 = arith.constant 0 : i32
    return %c0_i32, %c0_i32_0 : i32, i32
  }
  func.func @transform_2(%arg0: i32) -> (i32, i32) {
    %c0_i32 = arith.constant 0 : i32
    %c0_i32_0 = arith.constant 0 : i32
    %c0_i32_1 = arith.constant 0 : i32
    return %c0_i32, %c0_i32_0 : i32, i32
  }
  func.func @transform_3(%arg0: i32) -> (i32, i32) {
    %c0_i32 = arith.constant 0 : i32
    %c0_i32_0 = arith.constant 0 : i32
    %c0_i32_1 = arith.constant 0 : i32
    return %c0_i32, %c0_i32_0 : i32, i32
  }
  func.func @transform_4(%arg0: i32) -> (i32, i32) {
    %c0_i32 = arith.constant 0 : i32
    %c0_i32_0 = arith.constant 0 : i32
    %c0_i32_1 = arith.constant 0 : i32
    return %c0_i32, %c0_i32_0 : i32, i32
  }
  func.func @transform_5(%arg0: i32) -> (i32, i32) {
    %c0_i32 = arith.constant 0 : i32
    %c0_i32_0 = arith.constant 0 : i32
    return %arg0, %c0_i32 : i32, i32
  }
}

</mosaic_0001>

<bundles_post_ra>
// kernel: tpu_custom_call.1
= control target key start
LH: loop header
LB: loop body
LE: loop exit
PB: predicated region body
PF: predicated region fallthrough
CT: control target
= control target key end

     0   :  { %6 = vsyncpa [#allocation3], 0  ;;  %s482_s0 = inlined_call_operand.hbm [shape: f32[8,128], index: 0, kind: input, shape index: {}]   ;;  %s483_s1 = inlined_call_operand.hbm [shape: f32[16,128], index: 1, kind: output, shape index: {}]  }
   0x1   :  { %7 = vsyncpa [#allocation4], 0 }
   0x2   :  { %9 = vsyncpa [#allocation4 + $0x1], 0  ;;  %s352_s6 = smov 0   ;;  %s354_s7 = smov 0  }
   0x3   :  { %s356_s8 = smov 0   ;;  %s358_s9 = smov 0  }
   0x4 LB: > { %s373_s10 = sadd.s32 4294967295, %s338_s9   ;;  %s184_s11 = sadd.s32 4294967294, %s338_s9   ;;  %s338_s9 = sphi %s358_s9, %s499_s9   ;;  %s334_s8 = sphi %s356_s8, %s498_s8   ;;  %s330_s7 = sphi %s354_s7, %s497_s7   ;;  %s326_s6 = sphi %s352_s6, %s496_s6  }
   0x5   : > { %s377_s12 = sadd.s32 1, %s338_s9   ;;  %s43_s13 = sadd.s32 1, %s334_s8 }
   0x6   : > { %s40_s14 = ssub.s32 %s338_s9, %s377_s12  ;;  %p53_p0 = scmp.ne.s32.totalorder %s334_s8, %s330_s7 }
   0x7   : > { %p41_p1 = scmp.eq.s32.totalorder %s40_s14, 0  ;;  %p54_p2 = scmp.eq.s32.totalorder %s373_s10, 1 }
   0x8   : > { %p59_p3 = scmp.ne.s32.totalorder %s330_s7, %s326_s6  ;;  %p60_p4 = scmp.eq.s32.totalorder %s184_s11, 1 }
   0x9   : > { %s388_s15 = scalar_select %p41_p1, %s334_s8, %s43_s13  }
   0xa   : > { %p390_p5 = por %p54_p2, %p53_p0  ;;  %p394_p6 = por %p60_p4, %p59_p3 }
   0xb   : > { %p185_p7 = scmp.ge.s32.totalorder %s338_s9, 1  ;;  %p67_p8 = scmp.lt.s32.totalorder %s338_s9, 3 }
   0xc   : > { %s487_s16 = scalar_select %p390_p5, 1, 0 }
   0xd   : > { %s488_s17 = scalar_select %p394_p6, 1, 0 }
   0xe   : > { %p484_p9 = scmp.eq.s32.totalorder %s373_s10, 0  ;;  %p401_p10 = pnand %p185_p7, %p67_p8 }
   0xf   : > { %s340_s19 = smov [#allocation2]   ;;  %s244_s24 = scalar_lea.hbm %s482_s0, 128 }
  0x10   : > { %s489_s18 = scalar_select %p401_p10, 1, 0 }
  0x11   : > { %s80_s20 = sshll.u32 %s340_s19, 4  ;;  %p200_p11 = pneg %p401_p10  ;;  %s81_s20 = int_to_ptr.vmem [resolvable:$true] %s80_s20 }
  0x12   : > { %p245_p13 = scmp.ne.s32.totalorder %s482_s0, %s244_s24  ;;  %p251_p3 = scmp.lt.u32.totalorder %s244_s24, %s482_s0 }
  0x13   : > { %p409_p12 = pnand %p484_p9, %p200_p11 }
  0x15   : > { %p246_p0 = pneg %p409_p12 }
  0x17   : > { %p247_p1 = pnand %p246_p0, %p245_p13 }
  0x19   : > { %p248_p2 = pneg %p247_p1 }
  0x1b   : > { %p253_p4 = pnand %p251_p3, %p248_p2 }
  0x1d   : > { %256 = shalt.err (!%p253_p4)
}
  0x1e   : > { %s257_s29 = scalar_lea.vmem %s81_s20, 128  ;;  %p265_p9 = scmp.lt.s32.totalorder %s81_s20, %s81_s20 }
  0x1f   : > { %p258_p7 = scmp.ne.s32.totalorder %s81_s20, %s257_s29  ;;  %p266_p6 = scmp.lt.s32.totalorder %s257_s29, %s257_s29 }
  0x21   : > { %p260_p8 = pnand %p258_p7, %p246_p0  ;;  %p267_p5 = por %p266_p6, %p265_p9 }
  0x23   : > { %p261_p11 = pneg %p260_p8 }
  0x25   : > { %p268_p10 = pnand %p267_p5, %p261_p11 }
  0x27   : > { %271 = shalt.err (!%p268_p10)
}
  0x28   : > { %203 = dma.hbm_to_vmem [thread:$0]  (!%p409_p12), %s482_s0, 128, %s81_s20, [#allocation3]  }
  0x29   : > { %p491_p13 = scmp.ne.s32.totalorder %s489_s18, 0 }
  0x2a   : > { %p492_p1 = scmp.eq.s32.totalorder (!%p491_p13), %s373_s10, 0 }
  0x2b   : > { %93 = sbr.rel (%p491_p13) target bundleno = 77 (0x4d), region = 24 }
  0x32   : > { %317 = dma.done.wait (%p492_p1), [#allocation3], 128   ;;  %p493_p0 = pmov %p492_p1 }
  0x33   : > { %s105_s3 = sand.u32 1, %s330_s7   ;;  %s191_s13 = sshll.u32 %s373_s10, 7  ;;  %v108_v0 = vld [vmem:[#allocation2] sm:$0xff] }
  0x34   : > { %319 = vsyncadd (%p493_p0), [#allocation3], 4294967168  ;;  %s189_s4 = sshll.u32 %s105_s3, 3  ;;  %v109_v1 = vmul.f32 2.0, %v108_v0  ;;  %s442_s19 = scalar_lea.hbm %s483_s1, %s191_s13 }
  0x35   : > { %s107_s5 = scalar_lea.vmem [#allocation5], %s189_s4  ;;  %s112_s20 = scalar_lea.sflag [#allocation4], %s105_s3 }
  0x36   : > { %s125_s11 = sshll.u32 %s107_s5, 4  ;;  %110 = vst [vmem:[%s107_s5] sm:$0xff] %v109_v1  ;;  %p494_p6 = scmp.ne.s32.totalorder %s487_s16, 0  ;;  %s437_s11 = int_to_ptr.vmem [resolvable:$true] %s125_s11 }
  0x37   : > { %s272_s21 = scalar_lea.vmem %s437_s11, 128  ;;  %s341_s10 = smov [#allocation5]  }
  0x38   : > { %p273_p5 = scmp.ne.s32.totalorder %s437_s11, %s272_s21  ;;  %s276_s22 = sshll.u32 %s341_s10, 4  ;;  %s277_s22 = int_to_ptr.vmem [resolvable:$false] %s276_s22 }
  0x39   : > { %s278_s23 = scalar_lea.vmem %s277_s22, 256  ;;  %p279_p12 = scmp.lt.s32.totalorder %s437_s11, %s277_s22 }
  0x3a   : > { %p274_p9 = pnand %p273_p5, %p494_p6  ;;  %p280_p2 = scmp.lt.s32.totalorder %s278_s23, %s272_s21 }
  0x3c   : > { %p275_p10 = pneg %p274_p9  ;;  %p281_p3 = por %p280_p2, %p279_p12 }
  0x3e   : > { %p282_p4 = pnand %p281_p3, %p275_p10 }
  0x40   : > { %285 = shalt.err (!%p282_p4)
}
  0x41   : > { %s286_s24 = scalar_lea.hbm %s442_s19, 128  ;;  %s290_s27 = scalar_lea.hbm %s483_s1, 256 }
  0x42   : > { %p287_p7 = scmp.ne.s32.totalorder %s442_s19, %s286_s24  ;;  %p291_p13 = scmp.lt.u32.totalorder %s442_s19, %s483_s1 }
  0x43   : > { %p292_p1 = scmp.lt.u32.totalorder %s290_s27, %s286_s24  ;;  %p294_p5 = scmp.lt.u32.totalorder %s286_s24, %s442_s19 }
  0x44   : > { %p288_p8 = pnand %p287_p7, %p494_p6 }
  0x45   : > { %p293_p0 = por %p292_p1, %p291_p13 }
  0x46   : > { %p289_p11 = pneg %p288_p8 }
  0x47   : > { %p295_p9 = por %p294_p5, %p293_p0 }
  0x49   : > { %p296_p10 = pnand %p295_p9, %p289_p11 }
  0x4b   : > { %299 = shalt.err (!%p296_p10)
}
  0x4c   : > { %198 = dma.vmem_to_hbm [thread:$0]  (%p494_p6), %s437_s11, 128, %s442_s19, %s112_s20  }
  0x4d PF: > { %p210_p12 = scmp.ge.s32.totalorder %s338_s9, 2  ;;  %s137_s30 = sand.u32 1, %s326_s6  }
  0x4e   : > { %p495_p2 = scmp.ne.s32.totalorder %s488_s17, 0  ;;  %s138_s2 = scalar_lea.sflag [#allocation4], %s137_s30 }
  0x50   : > { %p205_p3 = pnand %p210_p12, %p495_p2 }
  0x52   : > { %321 = dma.done.wait (!%p205_p3), %s138_s2, 128  }
  0x53   : > { %323 = vsyncadd (!%p205_p3), %s138_s2, 4294967168  ;;  %p12_p4 = scmp.ge.s32.totalorder %s377_s12, 4   ;;  %s496_s6 = smov %s330_s7 }
  0x54   : > { %s497_s7 = smov %s334_s8  ;;  %s498_s8 = smov %s388_s15 }
  0x55   : > { %s499_s9 = smov %s377_s12  ;;  %14 = sbr.rel (!%p12_p4) target bundleno = 4 (0x4), region = 61 }
  0x5c   :  { %143 = vsyncpa [#allocation3], 1 }
  0x5d   :  { %145 = vsyncpa [#allocation3 + $0x1], 1 }
  0x5e   :  { %146 = vsyncpa [#allocation4], 1 }
  0x5f   :  { %148 = vsyncpa [#allocation4 + $0x1], 1 }

// kernel: tpu_custom_call.1
= control target key start
LH: loop header
LB: loop body
LE: loop exit
PB: predicated region body
PF: predicated region fallthrough
CT: control target
= control target key end

     0   :  { %10 = vsyncpa [#allocation3], 0  ;;  %s835_s0 = inlined_call_operand.vmem [shape: bf16[16,32], index: 0, kind: input, shape index: {}]   ;;  %s836_s1 = inlined_call_operand.vmem [shape: bf16[32,128], index: 1, kind: input, shape index: {}]   ;;  %s837_s2 = inlined_call_operand.vmem [shape: f32[1,128], index: 2, kind: input, shape index: {}]   ;;  %s838_s3 = inlined_call_operand.vmem [shape: bf16[128,32], index: 3, kind: input, shape index: {}]   ;;  %s839_s4 = inlined_call_operand.vmem [shape: f32[1,32], index: 4, kind: input, shape index: {}]   ;;  %s840_s5 = inlined_call_operand.hbm [shape: bf16[16,32], index: 5, kind: output, shape index: {}]  }
   0x1   :  { %12 = vsyncpa [#allocation3 + $0x1], 0  ;;  %s699_s18 = smov 0   ;;  %s701_s19 = smov 0  }
   0x2   :  { %s703_s20 = smov 0   ;;  %s705_s21 = smov 0  }
   0x3 LB: > { %s720_s22 = sadd.s32 4294967295, %s664_s21   ;;  %s486_s23 = sadd.s32 4294967294, %s664_s21   ;;  %s664_s21 = sphi %s705_s21, %s846_s21   ;;  %s660_s20 = sphi %s703_s20, %s845_s20   ;;  %s656_s19 = sphi %s701_s19, %s844_s19   ;;  %s652_s18 = sphi %s699_s18, %s843_s18  }
   0x4   : > { %s724_s24 = sadd.s32 1, %s664_s21   ;;  %s135_s25 = sadd.s32 1, %s660_s20 }
   0x5   : > { %s132_s26 = ssub.s32 %s664_s21, %s724_s24  ;;  %p145_p0 = scmp.ne.s32.totalorder %s660_s20, %s656_s19 }
   0x6   : > { %p133_p1 = scmp.eq.s32.totalorder %s132_s26, 0  ;;  %p146_p2 = scmp.eq.s32.totalorder %s720_s22, 1 }
   0x7   : > { %p151_p3 = scmp.ne.s32.totalorder %s656_s19, %s652_s18  ;;  %p152_p4 = scmp.eq.s32.totalorder %s486_s23, 1 }
   0x8   : > { %s735_s27 = scalar_select %p133_p1, %s660_s20, %s135_s25  }
   0x9   : > { %p737_p5 = por %p146_p2, %p145_p0  ;;  %p741_p6 = por %p152_p4, %p151_p3 }
   0xa   : > { %p489_p7 = scmp.ge.s32.totalorder %s664_s21, 1  ;;  %p189_p8 = scmp.lt.s32.totalorder %s664_s21, 3 }
   0xc   : > { %p190_p9 = pnand %p489_p7, %p189_p8 }
   0xd   : > { %v590_v0 = vld [vmem:[%s836_s1] sm:$0xff] (!%p190_p9)   ;;  %v666_v1 = vmov (!%p190_p9), 0.0   ;;  %v591_v2 = vld [vmem:[%s836_s1 + $0x8] sm:$0xff] (!%p190_p9)   ;;  %vm667_vm0 = vmmov (!%p190_p9), 0   ;;  %p216_p10 = scmp.lt.s32.totalorder (!%p190_p9), %s720_s22, 1  ;;  %vm245_vm1 = vcmask (!%p190_p9), 261120  }
   0xe   : > { %193 = sbr.rel (%p190_p9) target bundleno = 497 (0x1f1), region = 40  ;;  %521 = vmatprep.subr.bf16.mxu0 (!%p190_p9), %v666_v1  ;;  %529 = vmatprep.subr.bf16.mxu1 (!%p190_p9), %v666_v1  ;;  %v592_v3 = vld [vmem:[%s838_s3] sm:$0xff] (!%p190_p9)   ;;  %v593_v5 = vld [vmem:[%s838_s3 + $0x8] sm:$0xff] (!%p190_p9)   ;;  %v594_v6 = vld [vmem:[%s838_s3 + $0x10] sm:$0xff] (!%p190_p9)   ;;  %s213_s16 = sand.u32 (!%p190_p9), 1, %s656_s19   ;;  %vm411_vm2 = vcmask (!%p190_p9), 257024  }
   0xf   : > { %522 = vmatpush3.bf16.msra.mxu0 (!%p190_p9), %v590_v0  ;;  %525 = vmatprep.mubr.msk.bf16.mxu0 (!%p190_p9), %vm667_vm0, %v666_v1  ;;  %v595_v7 = vld [vmem:[%s838_s3 + $0x18] sm:$0xff] (!%p190_p9)   ;;  %v596_v8 = vld [vmem:[%s838_s3 + $0x20] sm:$0xff] (!%p190_p9)   ;;  %v597_v9 = vld [vmem:[%s838_s3 + $0x28] sm:$0xff] (!%p190_p9)   ;;  %s490_s17 = sshll.u32 (!%p190_p9), %s213_s16, 2  ;;  %s506_s26 = sshll.u32 (!%p190_p9), %s720_s22, 6 }
  0x10   : > { %523 = vmatprep.subr.bf16.mxu0 (!%p190_p9), %v666_v1  ;;  %545 = vmatprep.mubr.msk.bf16.mxu1 (!%p190_p9), %vm667_vm0, %v666_v1  ;;  %v598_v10 = vld [vmem:[%s838_s3 + $0x30] sm:$0xff] (!%p190_p9)   ;;  %v599_v11 = vld [vmem:[%s838_s3 + $0x38] sm:$0xff] (!%p190_p9)   ;;  %v492_v12 = vld [vmem:[%s837_s2] ss:$0 sm:$0xff] (!%p190_p9)  ;;  %s215_s30 = scalar_lea.vmem (!%p190_p9), [#allocation2], %s490_s17  ;;  %s793_s9 = scalar_lea.hbm (!%p190_p9), %s840_s5, %s506_s26 }
  0x11   : > { %530 = vmatpush3.bf16.msra.mxu1 (!%p190_p9), %v592_v3  ;;  %v496_v28 = vld [vmem:[%s839_s4] ss:$0 sm:$0xff] (!%p190_p9)  ;;  %s427_s6 = sshll.u32 (!%p190_p9), %s215_s30, 4  ;;  %s795_s6 = int_to_ptr.vmem [resolvable:$true] %s427_s6 }
  0x12   : > { %531 = vmatprep.subr.bf16.mxu1 (!%p190_p9), %v666_v1  ;;  %s602_s10 = scalar_lea.vmem (!%p190_p9), %s795_s6, 64 }
  0x13   : > { %524 = vmatpush3.bf16.msra.mxu0 (!%p190_p9), %v591_v2  ;;  %p603_p11 = scmp.ne.s32.totalorder (!%p190_p9), %s795_s6, %s602_s10 }
  0x15   : > { %s217_s11 = scalar_select %p216_p10, %s720_s22, 1  ;;  %532 = vmatpush3.bf16.msra.mxu1 %v593_v5 }
  0x16   : > { %533 = vmatprep.subr.bf16.mxu1 %v666_v1  ;;  %s414_s22 = scalar_lea.sflag [#allocation3], %s213_s16  ;;  %p604_p12 = pnand %p603_p11, %p737_p5 }
  0x17   : > { %s491_s12 = sshll.u32 %s217_s11, 2  ;;  %s668_s11 = smov [#allocation2]  }
  0x18   : > { %s219_s15 = scalar_lea.vmem %s835_s0, %s491_s12  ;;  %p605_p13 = pneg %p604_p12 }
  0x19   : > { %v221_v4 = vld [vmem:[%s219_s15] sm:$0xf]  ;;  %534 = vmatpush3.bf16.msra.mxu1 %v594_v6  ;;  %s606_s12 = sshll.u32 %s668_s11, 4  ;;  %s607_s12 = int_to_ptr.vmem [resolvable:$false] %s606_s12 }
  0x1a   : > { %526 = vmatmul.mubr.msk.bf16.vlgmr.msra.gmra.mrb[0].mxu0 %vm245_vm1, %v221_v4  ;;  %535 = vmatprep.subr.bf16.mxu1 %v666_v1  ;;  %s608_s13 = scalar_lea.vmem %s607_s12, 128  ;;  %p609_p0 = scmp.lt.s32.totalorder %s795_s6, %s607_s12 }
  0x1b   : > { %p610_p1 = scmp.lt.s32.totalorder %s608_s13, %s602_s10 }
  0x1d   : > { %536 = vmatpush3.bf16.msra.mxu1 %v595_v7  ;;  %p611_p2 = por %p610_p1, %p609_p0 }
  0x1e   : > { %537 = vmatprep.subr.bf16.mxu1 %v666_v1 }
  0x1f   : > { %p612_p3 = pnand %p611_p2, %p605_p13 }
  0x21   : > { %538 = vmatpush3.bf16.msra.mxu1 %v596_v8 }
  0x22   : > { %539 = vmatprep.subr.bf16.mxu1 %v666_v1 }
  0x25   : > { %540 = vmatpush3.bf16.msra.mxu1 %v597_v9 }
  0x26   : > { %541 = vmatprep.subr.bf16.mxu1 %v666_v1 }
  0x29   : > { %542 = vmatpush3.bf16.msra.mxu1 %v598_v10 }
  0x2a   : > { %543 = vmatprep.subr.bf16.mxu1 %v666_v1 }
  0x2d   : > { %544 = vmatpush3.bf16.msra.mxu1 %v599_v11 }
  0xed   : > { %v283_v13 = vpop.f32.mrb[0].mxu0 }
  0xee   : > { %v284_v14 = vadd.f32 %v492_v12, %v283_v13  ;;  %v527_v15 = vpop.f32.mrb[1].mxu0 }
  0xef   : > { %v286_v16 = vpop.f32.mrb[2].mxu0 }
  0xf0   : > { %v290_v17 = vmul.f32 0.044715, %v284_v14  ;;  %v528_v18 = vpop.f32.mrb[3].mxu0  ;;  %v289_v24 = vmul.f32 0.5, %v284_v14 }
  0xf2   : > { %v291_v19 = vmul.f32 %v290_v17, %v284_v14 }
  0xf4   : > { %v292_v20 = vmul.f32 %v291_v19, %v284_v14 }
  0xf6   : > { %v293_v21 = vadd.f32 %v292_v20, %v284_v14 }
  0xf8   : > { %v294_v22 = vmul.f32 0.7978846, %v293_v21 }
  0xfa   : > { %600 = vtanh.f32 %v294_v22 }
 0x104   : > { %v601_v23 = vpop.eup %600 }
 0x105   : > { %v296_v25 = vadd.f32 1.0, %v601_v23 }
 0x107   : > { %v297_v26 = vmul.f32 %v296_v25, %v289_v24 }
 0x109   : > { %v298_v27 = vpack.c.bf16 %v297_v26, %v297_v26 }
 0x10b   : > { %546 = vmatmul.mubr.bf16.vlgmr.msra.gmra.mrb[0].mxu1 %v298_v27 }
 0x1de   : > { %v404_v29 = vpop.f32.mrb[0].mxu1 }
 0x1df   : > { %v405_v30 = vadd.f32 %v496_v28, %v404_v29  ;;  %v547_v31 = vpop.f32.mrb[1].mxu1 }
 0x1e0   : > { %v407_v32 = vpop.f32.mrb[2].mxu1 }
 0x1e1   : > { %v410_v33 = vpack.c.bf16 %v405_v30, %v405_v30  ;;  %v548_v34 = vpop.f32.mrb[3].mxu1 }
 0x1e3   : > { %412 = vst.msk [vmem:[%s215_s30] sm:$0xf] %vm411_vm2, %v410_v33 }
 0x1e4   : > { %615 = shalt.err (!%p612_p3)
}
 0x1e5   : > { %s616_s14 = scalar_lea.hbm %s793_s9, 64  ;;  %s620_s17 = scalar_lea.hbm %s840_s5, 128 }
 0x1e6   : > { %p617_p4 = scmp.ne.s32.totalorder %s793_s9, %s616_s14  ;;  %p621_p9 = scmp.lt.u32.totalorder %s793_s9, %s840_s5 }
 0x1e7   : > { %p622_p10 = scmp.lt.u32.totalorder %s620_s17, %s616_s14  ;;  %p624_p12 = scmp.lt.u32.totalorder %s616_s14, %s793_s9 }
 0x1e8   : > { %p618_p7 = pnand %p617_p4, %p737_p5 }
 0x1e9   : > { %p623_p11 = por %p622_p10, %p621_p9 }
 0x1ea   : > { %p619_p8 = pneg %p618_p7 }
 0x1eb   : > { %p625_p13 = por %p624_p12, %p623_p11 }
 0x1ed   : > { %p626_p0 = pnand %p625_p13, %p619_p8 }
 0x1ef   : > { %629 = shalt.err (!%p626_p0)
}
 0x1f0   : > { %549 = dma.vmem_to_hbm [thread:$0]  (%p737_p5), %s795_s6, 64, %s793_s9, %s414_s22  }
 0x1f1 PF: > { %p555_p1 = scmp.ge.s32.totalorder %s664_s21, 2  ;;  %s439_s26 = sand.u32 1, %s652_s18  }
 0x1f2   : > { %s440_s30 = scalar_lea.sflag [#allocation3], %s439_s26 }
 0x1f3   : > { %p552_p2 = pnand %p555_p1, %p741_p6 }
 0x1f5   : > { %647 = dma.done.wait (!%p552_p2), %s440_s30, 64  }
 0x1f6   : > { %649 = vsyncadd (!%p552_p2), %s440_s30, 4294967232  ;;  %p15_p3 = scmp.ge.s32.totalorder %s724_s24, 4   ;;  %s843_s18 = smov %s656_s19 }
 0x1f7   : > { %s844_s19 = smov %s660_s20  ;;  %s845_s20 = smov %s735_s27 }
 0x1f8   : > { %s846_s21 = smov %s724_s24  ;;  %17 = sbr.rel (!%p15_p3) target bundleno = 3 (0x3), region = 75 }
 0x1ff   :  { %445 = vsyncpa [#allocation3], 1 }
 0x200   :  { %447 = vsyncpa [#allocation3 + $0x1], 1 }

</bundles_post_ra>
